<compile_context>
chip_gen: v6e
topology: v6e:2x2x1
jax: 0.10.0
libtpu: 0.0.40
codegen_flags: <defaults>
</compile_context>

<pallas_src>
import functools

import jax
import jax.numpy as jnp
from jax.experimental import pallas as pl
from jax.experimental.pallas import tpu as pltpu


def _group_norm_kernel(x_ref, w_ref, b_ref, o_ref, *, eps: float, hw: int,
                       affine_dtype):
    # x_ref : (1, GB, R, L)  GB whole groups, each repacked as (R, L)
    # w_ref : (GB, R, K)     per-row affine weights (K channels per row)
    # b_ref : (GB, R, K)     per-row affine bias
    gb, rows, k = w_ref.shape
    lanes = x_ref.shape[-1]

    # ---- Stats pass: f32 accumulation; temps die before the affine pass.
    xf = x_ref[0].astype(jnp.float32)                 # (GB, R, L)
    row_s1 = jnp.sum(xf, axis=2, keepdims=True)       # (GB, R, 1) lane reduce
    row_s2 = jnp.sum(xf * xf, axis=2, keepdims=True)  # (GB, R, 1)
    s1 = jnp.sum(row_s1, axis=1, keepdims=True)       # (GB, 1, 1) sublane red.
    s2 = jnp.sum(row_s2, axis=1, keepdims=True)       # (GB, 1, 1)

    inv_cnt = 1.0 / float(rows * lanes)
    mean = s1 * inv_cnt
    var = jnp.maximum(s2 * inv_cnt - mean * mean, 0.0)  # guard cancellation
    inv_std = jax.lax.rsqrt(var + eps)                  # (GB, 1, 1), EUP

    # ---- Fused per-channel affine: out = x * scale + shift.
    w = w_ref[...].astype(jnp.float32)                # (GB, R, K)
    b = b_ref[...].astype(jnp.float32)
    scale = w * inv_std                               # (GB, R, K)
    shift = b - mean * scale

    if k > 1:
        # K whole channels per row: lane l belongs to channel l // hw of its
        # row.  Expand via K cheap lane-broadcast selects (pure VPU work, no
        # lane->sublane relayout, no reshape across the lane dim).
        lane_chan = jax.lax.broadcasted_iota(jnp.int32, (1, 1, lanes), 2) // hw
        scale_l = jnp.broadcast_to(scale[:, :, 0:1], (gb, rows, lanes))
        shift_l = jnp.broadcast_to(shift[:, :, 0:1], (gb, rows, lanes))
        for j in range(1, k):
            sel = lane_chan == j
            scale_l = jnp.where(sel, scale[:, :, j:j + 1], scale_l)
            shift_l = jnp.where(sel, shift[:, :, j:j + 1], shift_l)
        scale, shift = scale_l, shift_l

    scale = scale.astype(affine_dtype)
    shift = shift.astype(affine_dtype)
    x2 = x_ref[0].astype(affine_dtype)  # re-read tile; bf16 path on v6e/v7x
    o_ref[0] = (x2 * scale + shift).astype(o_ref.dtype)


def _has_bf16_vpu() -> bool:
    """v6e/v7x have a bf16 VPU; v2-v5 do not."""
    try:
        kind = jax.devices()[0].device_kind.lower()
    except Exception:
        return True
    return not any(f"v{n}" in kind for n in (2, 3, 4, 5))


def _choose_layout(cpg: int, hw: int, itemsize: int):
    """Pick (L, K): row lane-width L and number K of whole channels per row.

    K == 1 means each row is a contiguous slice of one channel's spatial dim.
    Prefers L a multiple of 128 (unmasked stores) and enough rows to fill the
    sublanes for the input dtype.
    """
    min_rows = {4: 8, 2: 16, 1: 32}.get(itemsize, 8)
    total = cpg * hw
    cands = []
    for l in range(128, hw + 1, 128):        # split one channel's spatial
        if hw % l == 0:
            cands.append((l, 1))
    for k in range(2, cpg + 1):              # pack K whole channels per row
        l = k * hw
        if l % 128 == 0 and cpg % k == 0:
            cands.append((l, k))
    if not cands:
        # TODO(synk): no lane-dense decomposition exists (e.g. 7x7 spatial
        # with odd channels-per-group); fall back to masked stores.
        return hw, 1
    good = [c for c in cands if total // c[0] >= min_rows]
    if good:
        return max(good)   # widest lane-dense row that still fills sublanes
    return min(cands)      # otherwise maximize rows (smallest L >= 128)


def _pick_group_block(num_groups: int, group_bytes_f32: int,
                      target_bytes: int = 3 << 20) -> int:
    """Largest divisor of G keeping the per-step f32 tile within ~3 MiB."""
    limit = max(target_bytes, group_bytes_f32)
    gb = 1
    for cand in range(1, num_groups + 1):
        if num_groups % cand == 0 and cand * group_bytes_f32 <= limit:
            gb = cand
    return gb


def group_norm(x, weight, bias, *, num_groups: int, eps: float = 1e-5):
    """GroupNorm forward. x: (N, C, H, W); weight, bias: (C,)."""
    N, C, H, W = x.shape
    G = num_groups
    assert C % G == 0
    Cpg = C // G
    HW = H * W

    itemsize = jnp.dtype(x.dtype).itemsize
    L, K = _choose_layout(Cpg, HW, itemsize)
    R = (Cpg * HW) // L

    group_bytes_f32 = Cpg * HW * 4
    GB = _pick_group_block(G, group_bytes_f32)
    # Require >= 8 total grid steps so the pipeline can overlap DMA with
    # compute and both v7x TensorCores get balanced work.
    while GB > 1 and N * (G // GB) < 8:
        GB = max(d for d in range(1, GB) if G % d == 0)

    x_r = x.reshape(N, G, R, L)
    if K == 1:
        rep = HW // L  # rows per channel
        w_r = jnp.repeat(weight, rep).reshape(G, R, 1)
        b_r = jnp.repeat(bias, rep).reshape(G, R, 1)
    else:
        w_r = weight.reshape(G, R, K)
        b_r = bias.reshape(G, R, K)

    # Affine-pass dtype: bf16 only for bf16 inputs on chips with a bf16 VPU.
    affine_dt = (jnp.bfloat16
                 if (x.dtype == jnp.bfloat16 and _has_bf16_vpu())
                 else jnp.float32)

    # VMEM budget: double-buffered input + output tiles (input dtype) plus a
    # few full-tile f32 intermediates in the body, floored at 32 MiB, capped
    # at min(48 MiB, 75% of physical VMEM) to leave v7x headroom.
    tile_elems = GB * R * L
    needed = tile_elems * (4 * itemsize + 16) + (2 << 20)
    try:
        phys = int(pltpu.get_tpu_info().vmem_capacity_bytes)
    except Exception:
        phys = 64 << 20  # conservative (v7x per-TC)
    cap = min(48 << 20, (phys * 3) // 4)
    vmem_limit = int(min(max(needed, 32 << 20), cap))

    cost = pl.CostEstimate(
        flops=8 * x.size,
        transcendentals=N * G,
        bytes_accessed=2 * x.size * itemsize
        + 2 * w_r.size * jnp.dtype(weight.dtype).itemsize,
    )

    kernel = functools.partial(_group_norm_kernel, eps=float(eps), hw=HW,
                               affine_dtype=affine_dt)

    out = pl.pallas_call(
        kernel,
        out_shape=jax.ShapeDtypeStruct((N, G, R, L), x.dtype),
        grid=(N, G // GB),
        in_specs=[
            pl.BlockSpec((1, GB, R, L), lambda n, g: (n, g, 0, 0)),
            pl.BlockSpec((GB, R, K), lambda n, g: (g, 0, 0)),
            pl.BlockSpec((GB, R, K), lambda n, g: (g, 0, 0)),
        ],
        out_specs=pl.BlockSpec((1, GB, R, L), lambda n, g: (n, g, 0, 0)),
        compiler_params=pltpu.CompilerParams(
            dimension_semantics=("parallel", "parallel"),
            vmem_limit_bytes=vmem_limit,
        ),
        cost_estimate=cost,
    )(x_r, w_r, b_r)

    return out.reshape(N, C, H, W)


def group_norm_ref(x, weight, bias, *, num_groups: int, eps: float = 1e-5):
    """Pure-JAX reference matching the PyTorch module."""
    N, C, H, W = x.shape
    G = num_groups
    xr = x.reshape(N, G, C // G, H, W).astype(jnp.float32)
    mean = xr.mean(axis=(2, 3, 4), keepdims=True)
    var = ((xr - mean) ** 2).mean(axis=(2, 3, 4), keepdims=True)
    xn = (xr - mean) / jnp.sqrt(var + eps)
    xn = xn.reshape(N, C, H, W)
    return xn * weight.reshape(1, C, 1, 1) + bias.reshape(1, C, 1, 1)


if __name__ == "__main__":
    key = jax.random.PRNGKey(0)
    N, C, H, W = 2, 4, 16, 16
    num_groups = 2
    eps = 1e-5

    x = jax.random.normal(key, (N, C, H, W), dtype=jnp.float32)

    # Module's reset_parameters() -> weight = ones, bias = zeros. Shapes: (C,).
    # Use deterministic non-trivial values to also exercise the affine path.
    weight = jnp.linspace(0.5, 1.5, C, dtype=jnp.float32)
    bias = jnp.linspace(-0.25, 0.25, C, dtype=jnp.float32)

    out = group_norm(x, weight, bias, num_groups=num_groups, eps=eps)
    out = jax.block_until_ready(out)

    ref = group_norm_ref(x, weight, bias, num_groups=num_groups, eps=eps)
    assert out.shape == (N, C, H, W)
    assert jnp.allclose(out, ref, atol=1e-4, rtol=1e-4), "mismatch vs reference"

    print("KERNEL_OK")
</pallas_src>

<mosaic_0001>
module attributes {stable_mosaic.version = 11 : i64} {
  func.func @_group_norm_kernel(%arg0: i32, %arg1: i32, %arg2: memref<1x1x4x128xf32, #tpu.memory_space<vmem>>, %arg3: memref<1x4x1xf32, #tpu.memory_space<vmem>>, %arg4: memref<1x4x1xf32, #tpu.memory_space<vmem>>, %arg5: memref<1x1x4x128xf32, #tpu.memory_space<vmem>>) attributes {dimension_semantics = [#tpu.dimension_semantics<parallel>, #tpu.dimension_semantics<parallel>], iteration_bounds = array<i64: 2, 2>, scalar_prefetch = 0 : i64, scratch_operands = 0 : i64, tpu.core_type = #tpu.core_type<tc>, window_params = [{transform_indices = @transform_0, window_bounds = array<i64: 1, 1, 4, 128>}, {transform_indices = @transform_1, window_bounds = array<i64: 1, 4, 1>}, {transform_indices = @transform_2, window_bounds = array<i64: 1, 4, 1>}, {transform_indices = @transform_3, window_bounds = array<i64: 1, 1, 4, 128>}]} {
    %c0 = arith.constant 0 : index
    %c0_0 = arith.constant 0 : index
    %c0_1 = arith.constant 0 : index
    %c0_2 = arith.constant 0 : index
    %0 = vector.load %arg2[%c0, %c0_0, %c0_1, %c0_2] : memref<1x1x4x128xf32, #tpu.memory_space<vmem>>, vector<1x1x4x128xf32>
    %1 = vector.shape_cast %0 : vector<1x1x4x128xf32> to vector<1x4x128xf32>
    %cst = arith.constant dense<0.000000e+00> : vector<1x4xf32>
    %2 = vector.multi_reduction <add>, %1, %cst [2] : vector<1x4x128xf32> to vector<1x4xf32>
    %3 = vector.shape_cast %2 : vector<1x4xf32> to vector<1x4x1xf32>
    %4 = arith.mulf %1, %1 : vector<1x4x128xf32>
    %cst_3 = arith.constant dense<0.000000e+00> : vector<1x4xf32>
    %5 = vector.multi_reduction <add>, %4, %cst_3 [2] : vector<1x4x128xf32> to vector<1x4xf32>
    %6 = vector.shape_cast %5 : vector<1x4xf32> to vector<1x4x1xf32>
    %cst_4 = arith.constant dense<0.000000e+00> : vector<1x1xf32>
    %7 = vector.multi_reduction <add>, %3, %cst_4 [1] : vector<1x4x1xf32> to vector<1x1xf32>
    %8 = vector.shape_cast %7 : vector<1x1xf32> to vector<1x1x1xf32>
    %cst_5 = arith.constant dense<0.000000e+00> : vector<1x1xf32>
    %9 = vector.multi_reduction <add>, %6, %cst_5 [1] : vector<1x4x1xf32> to vector<1x1xf32>
    %10 = vector.shape_cast %9 : vector<1x1xf32> to vector<1x1x1xf32>
    %cst_6 = arith.constant 0.001953125 : f32
    %11 = vector.broadcast %cst_6 : f32 to vector<1x1x1xf32>
    %12 = arith.mulf %8, %11 : vector<1x1x1xf32>
    %cst_7 = arith.constant 0.001953125 : f32
    %13 = vector.broadcast %cst_7 : f32 to vector<1x1x1xf32>
    %14 = arith.mulf %10, %13 : vector<1x1x1xf32>
    %15 = arith.mulf %12, %12 : vector<1x1x1xf32>
    %16 = arith.subf %14, %15 : vector<1x1x1xf32>
    %cst_8 = arith.constant 0.000000e+00 : f32
    %17 = vector.broadcast %cst_8 : f32 to vector<1x1x1xf32>
    %18 = arith.maximumf %16, %17 : vector<1x1x1xf32>
    %cst_9 = arith.constant 9.99999974E-6 : f32
    %19 = vector.broadcast %cst_9 : f32 to vector<1x1x1xf32>
    %20 = arith.addf %18, %19 : vector<1x1x1xf32>
    %21 = math.rsqrt %20 : vector<1x1x1xf32>
    %c0_10 = arith.constant 0 : index
    %c0_11 = arith.constant 0 : index
    %c0_12 = arith.constant 0 : index
    %22 = vector.load %arg3[%c0_10, %c0_11, %c0_12] : memref<1x4x1xf32, #tpu.memory_space<vmem>>, vector<1x4x1xf32>
    %c0_13 = arith.constant 0 : index
    %c0_14 = arith.constant 0 : index
    %c0_15 = arith.constant 0 : index
    %23 = vector.load %arg4[%c0_13, %c0_14, %c0_15] : memref<1x4x1xf32, #tpu.memory_space<vmem>>, vector<1x4x1xf32>
    %24 = vector.broadcast %21 : vector<1x1x1xf32> to vector<1x4x1xf32>
    %25 = arith.mulf %22, %24 : vector<1x4x1xf32>
    %26 = vector.broadcast %12 : vector<1x1x1xf32> to vector<1x4x1xf32>
    %27 = arith.mulf %26, %25 : vector<1x4x1xf32>
    %28 = arith.subf %23, %27 : vector<1x4x1xf32>
    %c0_16 = arith.constant 0 : index
    %c0_17 = arith.constant 0 : index
    %c0_18 = arith.constant 0 : index
    %c0_19 = arith.constant 0 : index
    %29 = vector.load %arg2[%c0_16, %c0_17, %c0_18, %c0_19] : memref<1x1x4x128xf32, #tpu.memory_space<vmem>>, vector<1x1x4x128xf32>
    %30 = vector.shape_cast %29 : vector<1x1x4x128xf32> to vector<1x4x128xf32>
    %31 = vector.broadcast %25 : vector<1x4x1xf32> to vector<1x4x128xf32>
    %32 = arith.mulf %30, %31 : vector<1x4x128xf32>
    %33 = vector.broadcast %28 : vector<1x4x1xf32> to vector<1x4x128xf32>
    %34 = arith.addf %32, %33 : vector<1x4x128xf32>
    %c0_20 = arith.constant 0 : index
    %c0_21 = arith.constant 0 : index
    %c0_22 = arith.constant 0 : index
    %c0_23 = arith.constant 0 : index
    %35 = vector.load %arg5[%c0_20, %c0_21, %c0_22, %c0_23] : memref<1x1x4x128xf32, #tpu.memory_space<vmem>>, vector<1x1x4x128xf32>
    %36 = vector.shape_cast %35 : vector<1x1x4x128xf32> to vector<1x4x128xf32>
    %37 = vector.shape_cast %34 : vector<1x4x128xf32> to vector<1x1x4x128xf32>
    tpu.vector_store %arg5[%c0_20, %c0_21, %c0_22, %c0_23], %37 {strides = array<i32>} : memref<1x1x4x128xf32, #tpu.memory_space<vmem>>, vector<1x1x4x128xf32>,
    return
  }
  func.func @transform_0(%arg0: i32, %arg1: i32) -> (i32, i32, i32, i32) {
    %c0_i32 = arith.constant 0 : i32
    %c0_i32_0 = arith.constant 0 : i32
    %c0_i32_1 = arith.constant 0 : i32
    return %arg0, %arg1, %c0_i32, %c0_i32_0 : i32, i32, i32, i32
  }
  func.func @transform_1(%arg0: i32, %arg1: i32) -> (i32, i32, i32) {
    %c0_i32 = arith.constant 0 : i32
    %c0_i32_0 = arith.constant 0 : i32
    %c0_i32_1 = arith.constant 0 : i32
    return %arg1, %c0_i32, %c0_i32_0 : i32, i32, i32
  }
  func.func @transform_2(%arg0: i32, %arg1: i32) -> (i32, i32, i32) {
    %c0_i32 = arith.constant 0 : i32
    %c0_i32_0 = arith.constant 0 : i32
    %c0_i32_1 = arith.constant 0 : i32
    return %arg1, %c0_i32, %c0_i32_0 : i32, i32, i32
  }
  func.func @transform_3(%arg0: i32, %arg1: i32) -> (i32, i32, i32, i32) {
    %c0_i32 = arith.constant 0 : i32
    %c0_i32_0 = arith.constant 0 : i32
    %c0_i32_1 = arith.constant 0 : i32
    return %arg0, %arg1, %c0_i32, %c0_i32_0 : i32, i32, i32, i32
  }
}

</mosaic_0001>

<bundles_post_ra>
// kernel: tpu_custom_call.1
= control target key start
LH: loop header
LB: loop body
LE: loop exit
PB: predicated region body
PF: predicated region fallthrough
CT: control target
= control target key end

     0   :  { %8 = vsyncpa [#allocation3], 0  ;;  %s739_s0 = inlined_call_operand.vmem [shape: f32[2,2,4,128], index: 0, kind: input, shape index: {}]   ;;  %s740_s1 = inlined_call_operand.vmem [shape: f32[2,4,1], index: 1, kind: input, shape index: {}]   ;;  %s741_s2 = inlined_call_operand.vmem [shape: f32[2,4,1], index: 2, kind: input, shape index: {}]   ;;  %s742_s3 = inlined_call_operand.hbm [shape: f32[2,2,4,128], index: 3, kind: output, shape index: {}]  }
   0x1   :  { %10 = vsyncpa [#allocation3 + $0x1], 0  ;;  %s601_s12 = smov 0   ;;  %s603_s13 = smov 0  }
   0x2   :  { %s605_s14 = smov 0   ;;  %s607_s15 = smov 0  }
   0x3   :  { %s609_s16 = smov 0   ;;  %s611_s17 = smov 0  }
   0x4   :  { %s613_s18 = smov 0   ;;  %s615_s19 = smov 0  }
   0x5 LB: > { %s394_s20 = sadd.s32 4294967295, %s577_s19   ;;  %s395_s21 = sadd.s32 4294967294, %s577_s19   ;;  %s577_s19 = sphi %s615_s19, %s16_s19   ;;  %s573_s18 = sphi %s613_s18, %s751_s18   ;;  %s569_s17 = sphi %s611_s17, %s750_s17   ;;  %s565_s16 = sphi %s609_s16, %s749_s16   ;;  %s561_s15 = sphi %s607_s15, %s748_s15   ;;  %s557_s14 = sphi %s605_s14, %s747_s14   ;;  %s553_s13 = sphi %s603_s13, %s746_s13   ;;  %s549_s12 = sphi %s601_s12, %s745_s12  }
   0x6   : > { %s25_s22 = sadd.s32 1, %s569_s17  ;;  %s28_s23 = sadd.s32 1, %s573_s18 }
   0x7   : > { %p26_p0 = scmp.ge.s32.totalorder %s25_s22, 2  ;;  %p127_p1 = scmp.ne.s32.totalorder %s557_s14, %s553_s13 }
   0x8   : > { %p128_p2 = scmp.eq.s32.totalorder %s394_s20, 3  ;;  %p133_p5 = scmp.ne.s32.totalorder %s553_s13, %s549_s12 }
   0x9   : > { %s753_s22 = smov (%p26_p0, %s25_s22), 0  ;;  %s755_s23 = smov (!%p26_p0, %s28_s23), %s573_s18 }
   0xa   : > { %s113_s24 = ssub.s32 %s569_s17, %s753_s22  ;;  %p652_p3 = por %p128_p2, %p127_p1 }
   0xb   : > { %p30_p4 = scmp.ge.s32.totalorder %s755_s23, 2  ;;  %p134_p6 = scmp.eq.s32.totalorder %s395_s21, 3 }
   0xc   : > { %p398_p7 = scmp.ge.s32.totalorder %s577_s19, 1  ;;  %p177_p9 = scmp.lt.s32.totalorder %s577_s19, 5 }
   0xd   : > { %s757_s23 = smov (%p30_p4, %s755_s23), 0  ;;  %p661_p8 = por %p134_p6, %p133_p5 }
   0xe   : > { %s112_s27 = ssub.s32 %s573_s18, %s757_s23  ;;  %s117_s28 = sadd.s32 1, %s557_s14 }
   0xf   : > { %s114_s29 = sor.u32 %s113_s24, %s112_s27  ;;  %p178_p10 = pnand %p398_p7, %p177_p9 }
  0x10   : > { %p115_p11 = scmp.eq.s32.totalorder %s114_s29, 0  ;;  %p212_p12 = scmp.lt.s32.totalorder (!%p178_p10), %s565_s16, 1 }
  0x11   : > { %181 = sbr.rel (%p178_p10) target bundleno = 352 (0x160), region = 32  ;;  %p214_p13 = scmp.lt.s32.totalorder (!%p178_p10), %s561_s15, 1 }
  0x12   : > { %s670_s30 = scalar_select %p115_p11, %s557_s14, %s117_s28  }
  0x16   : > { %s213_s4 = scalar_select %p212_p12, %s565_s16, 1  ;;  %vm229_vm0 = vcmask 1043456   ;;  %v579_v4 = vmov 0  }
  0x17   : > { %s676_s5 = scalar_select %p214_p13, %s561_s15, 1  ;;  %481 = vset.pattern.permute.xlu1 %v579_v4  ;;  %482 = vset.pattern.permute.xlu0 %v579_v4 }
  0x18   : > { %s400_s6 = sshll.u32 %s213_s4, 1 }
  0x19   : > { %s217_s7 = sadd.s32 %s400_s6, %s676_s5  ;;  %s402_s20 = sshll.u32 %s676_s5, 2 }
  0x1a   : > { %s401_s8 = sshll.u32 %s217_s7, 2  ;;  %s223_s27 = scalar_lea.vmem %s740_s1, %s402_s20 }
  0x1b   : > { %s219_s11 = scalar_lea.vmem %s739_s0, %s401_s8  ;;  %v258_v27 = vld [vmem:[%s223_s27] sm:$0xf]  ;;  %s227_s4 = scalar_lea.vmem %s741_s2, %s402_s20 }
  0x1c   : > { %v228_v0 = vld [vmem:[%s219_s11] sm:$0xf]  ;;  %s209_s6 = sand.u32 1, %s553_s13   ;;  %s405_s5 = sshll.u32 %s565_s16, 1 }
  0x1d   : > { %v230_v1 = vsel %vm229_vm0, %v228_v0, 0.0  ;;  %v233_v2 = vmul.f32 %v228_v0, %v228_v0  ;;  %v259_v30 = vld [vmem:[%s227_s4] sm:$0xf]  ;;  %s399_s7 = sshll.u32 %s209_s6, 2  ;;  %s288_s8 = sadd.s32 %s561_s15, %s405_s5 }
  0x1e   : > { %231 = vadd.xlane.f32.xlu0 %v230_v1  ;;  %s406_s9 = sshll.u32 %s288_s8, 6  ;;  %s211_s10 = scalar_lea.vmem [#allocation2], %s399_s7 }
  0x1f   : > { %v234_v3 = vsel %vm229_vm0, %v233_v2, 0.0  ;;  %s292_s11 = sshll.u32 %s211_s10, 4  ;;  %s290_s24 = scalar_lea.hbm %s742_s3, %s406_s9  ;;  %s293_s11 = int_to_ptr.vmem [resolvable:$true] %s292_s11 }
  0x20   : > { %s277_s27 = scalar_lea.sflag [#allocation3], %s209_s6  ;;  %s485_s28 = scalar_lea.vmem %s293_s11, 64 }
  0x21   : > { %p486_p0 = scmp.ne.s32.totalorder %s293_s11, %s485_s28  ;;  %s580_s15 = smov [#allocation2]  }
  0x22   : > { %235 = vadd.xlane.f32.xlu0 %v234_v3  ;;  %s489_s16 = sshll.u32 %s580_s15, 4  ;;  %s490_s16 = int_to_ptr.vmem [resolvable:$false] %s489_s16 }
  0x23   : > { %p487_p1 = pnand %p486_p0, %p652_p3  ;;  %s491_s29 = scalar_lea.vmem %s490_s16, 128 }
  0x24   : > { %p492_p4 = scmp.lt.s32.totalorder %s293_s11, %s490_s16  ;;  %p493_p5 = scmp.lt.s32.totalorder %s491_s29, %s485_s28 }
  0x25   : > { %p488_p2 = pneg %p487_p1 }
  0x26   : > { %p494_p6 = por %p493_p5, %p492_p4 }
  0x28   : > { %p495_p7 = pnand %p494_p6, %p488_p2 }
  0xa7   : > { %v232_v5 = vpop.xlane.xlu0 %231 }
  0xa8   : > { %v237_v6 = vsel %vm229_vm0, %v232_v5, 0.0 }
  0xa9   : > { %v238_v7 = vrot.slane %v237_v6, 4 }
  0xab   : > { %v239_v8 = vadd.f32 %v238_v7, %v237_v6  ;;  %v236_v9 = vpop.xlane.xlu0 %235 }
  0xac   : > { %v244_v10 = vsel %vm229_vm0, %v236_v9, 0.0 }
  0xad   : > { %v240_v11 = vrot.slane %v239_v8, 2  ;;  %v245_v12 = vrot.slane %v244_v10, 4 }
  0xaf   : > { %v241_v13 = vadd.f32 %v240_v11, %v239_v8  ;;  %v246_v14 = vadd.f32 %v245_v12, %v244_v10 }
  0xb1   : > { %v242_v15 = vrot.slane %v241_v13, 1  ;;  %v247_v16 = vrot.slane %v246_v14, 2 }
  0xb3   : > { %v243_v17 = vadd.f32 %v242_v15, %v241_v13  ;;  %v248_v18 = vadd.f32 %v247_v16, %v246_v14 }
  0xb5   : > { %v249_v19 = vrot.slane %v248_v18, 1  ;;  %v251_v20 = vmul.f32 0.001953125, %v243_v17 }
  0xb7   : > { %v250_v21 = vadd.f32 %v249_v19, %v248_v18  ;;  %v253_v23 = vmul.f32 %v251_v20, %v251_v20 }
  0xb9   : > { %v252_v22 = vmul.f32 0.001953125, %v250_v21 }
  0xbb   : > { %v254_v24 = vsub.f32 %v252_v22, %v253_v23 }
  0xbd   : > { %v255_v25 = vmax.f32 %v254_v24, 0.0 }
  0xbf   : > { %v256_v26 = vadd.f32 1e-05, %v255_v25 }
  0xc1   : > { %483 = vrsqrt.f32 %v256_v26 }
  0xce   : > { %v484_v28 = vpop.eup %483 }
  0xcf   : > { %v260_v29 = vmul.f32 %v484_v28, %v258_v27 }
  0xd1   : > { %265 = vperm.xlu1 %481, %v260_v29   ;;  %v261_v31 = vmul.f32 %v260_v29, %v251_v20 }
  0xd3   : > { %v262_v32 = vsub.f32 %v259_v30, %v261_v31 }
  0xd5   : > { %271 = vperm.xlu1 %481, %v262_v32  }
 0x14c   : > { %v266_v33 = vpop.permute.xlu1 %265 }
 0x14d   : > { %v268_v34 = vmul.f32 %v266_v33, %v228_v0 }
 0x150   : > { %v272_v35 = vpop.permute.xlu1 %271 }
 0x151   : > { %v274_v36 = vadd.f32 %v272_v35, %v268_v34 }
 0x153   : > { %275 = vst [vmem:[%s211_s10] sm:$0xf] %v274_v36 }
 0x154   : > { %498 = shalt.err (!%p495_p7)
}
 0x155   : > { %s499_s4 = scalar_lea.hbm %s290_s24, 64  ;;  %s503_s5 = scalar_lea.hbm %s742_s3, 256 }
 0x156   : > { %p500_p9 = scmp.ne.s32.totalorder %s290_s24, %s499_s4  ;;  %p504_p12 = scmp.lt.s32.totalorder %s290_s24, %s742_s3 }
 0x157   : > { %p505_p13 = scmp.lt.s32.totalorder %s503_s5, %s499_s4 }
 0x158   : > { %p501_p10 = pnand %p500_p9, %p652_p3 }
 0x159   : > { %p506_p0 = por %p505_p13, %p504_p12 }
 0x15a   : > { %p502_p11 = pneg %p501_p10 }
 0x15c   : > { %p507_p1 = pnand %p506_p0, %p502_p11 }
 0x15e   : > { %510 = shalt.err (!%p507_p1)
}
 0x15f   : > { %409 = dma.vmem_to_hbm [thread:$0]  (%p652_p3), %s293_s11, 64, %s290_s24, %s277_s27  }
 0x160 PF: > { %p415_p2 = scmp.ge.s32.totalorder %s577_s19, 2  ;;  %s304_s10 = sand.u32 1, %s549_s12  }
 0x161   : > { %s305_s20 = scalar_lea.sflag [#allocation3], %s304_s10 }
 0x162   : > { %p412_p4 = pnand %p415_p2, %p661_p8 }
 0x164   : > { %p413_p5 = pneg %p412_p4 }
 0x166   : > { %544 = dma.done.wait (%p413_p5), %s305_s20, 64  }
 0x167   : > { %546 = vsyncadd (%p413_p5), %s305_s20, 4294967232  ;;  %s16_s19 = sadd.s32 1, %s577_s19   ;;  %s745_s12 = smov %s553_s13 }
 0x168   : > { %p13_p6 = scmp.ge.s32.totalorder %s16_s19, 6   ;;  %s746_s13 = smov %s557_s14 }
 0x169   : > { %s747_s14 = smov %s670_s30  ;;  %s748_s15 = smov %s569_s17 }
 0x16a   : > { %s749_s16 = smov %s573_s18  ;;  %s750_s17 = smov %s753_s22 }
 0x16b   : > { %s751_s18 = smov %s757_s23  ;;  %15 = sbr.rel (!%p13_p6) target bundleno = 5 (0x5), region = 73 }
 0x170   :  { %310 = vsyncpa [#allocation3], 1 }
 0x171   :  { %312 = vsyncpa [#allocation3 + $0x1], 1 }

</bundles_post_ra>
